<compile_context>
chip_gen: v7x
topology: tpu7x:2x2x1
jax: 0.10.0
libtpu: 0.0.40
codegen_flags: <defaults>
</compile_context>

<pallas_src>
import functools
import math

import jax
import jax.numpy as jnp
from jax.experimental import pallas as pl
from jax.experimental.pallas import tpu as pltpu


_UNROLL_LIMIT = 16  # static-unroll the operator chain up to this many matmuls


def _nbytes(a):
    return int(a.size) * int(jnp.dtype(a.dtype).itemsize)


def _apply_chain(d_ref, x, start, stop, compute_dtype):
    """x <- d[stop-1] @ ... @ d[start] @ x  (MXU matmuls).

    Interior matmuls emit in compute_dtype (keeps the live [N, TF] value
    narrow on the bf16 path); the final matmul of the chain emits f32 so
    shrinkage / filter / epilogue always see f32.
    """
    count = stop - start
    if count <= 0:
        return x
    if count <= _UNROLL_LIMIT:
        for idx, l in enumerate(range(start, stop)):   # static unroll
            out_dt = jnp.float32 if idx == count - 1 else compute_dtype
            x = jnp.dot(d_ref[l].astype(compute_dtype),
                        x.astype(compute_dtype),
                        preferred_element_type=out_dt)
        return x

    # Very long chains (rare): rolled loop with an f32 carry.
    def body(l, acc):
        return jnp.dot(d_ref[l].astype(compute_dtype),
                       acc.astype(compute_dtype),
                       preferred_element_type=jnp.float32)

    return jax.lax.fori_loop(start, stop, body, x.astype(jnp.float32))


def _ufgconv_kernel(num_ops, dec_count, rec_start, compute_dtype,
                    shrinkage, threshold,
                    x_ref, w_ref, d_ref, filt_ref, bias_ref, o_ref):
    # x_ref:    [N, Fin]          node features (grid-invariant, resident)
    # w_ref:    [Fin, TF]         output-feature tile of the weight
    # d_ref:    [num_ops, N, N]   framelet operators, or the two pre-composed
    #                             decomposition / reconstruction operators
    # filt_ref: [N, 1]            filter[:N], selected via the BlockSpec window
    # bias_ref: [1, TF]
    # o_ref:    [N, TF]           caller dtype, lane-dense tile
    cd = compute_dtype

    # Input transform for this feature tile: [N, Fin] @ [Fin, TF] -> f32.
    x = jnp.dot(x_ref[...].astype(cd), w_ref[...].astype(cd),
                preferred_element_type=jnp.float32)

    # Decomposition (spec: `for d in d_list: x = d @ x`).
    x = _apply_chain(d_ref, x, 0, dec_count, cd)

    # Optional shrinkage (static config branch) -- f32 VPU ops.
    if shrinkage == "soft":
        x = jnp.sign(x) * jnp.maximum(jnp.abs(x) - threshold, 0.0)
    elif shrinkage == "hard":
        x = jnp.where(jnp.abs(x) > threshold, x, 0.0)

    # Elementwise filter (filter[:N]) in f32, broadcast over feature lanes.
    x = x * filt_ref[...].astype(jnp.float32)

    # Reconstruction (spec: `for d in d_list[Lev-1:]: x = d @ x`).
    x = _apply_chain(d_ref, x, rec_start, num_ops, cd)

    # Fused epilogue: bias add + cast, one lane-dense store.
    o_ref[...] = (x + bias_ref[...].astype(jnp.float32)).astype(o_ref.dtype)


def _default_tile_f(f_out):
    # Lane-dense tiles; prefer a tile that yields >= 2 grid steps so the
    # "parallel" Fout axis can be sharded across v7x's two TensorCores.
    for tf in (512, 256, 128):
        if f_out % tf == 0 and f_out // tf >= 2:
            return tf
    for tf in (512, 256, 128):
        if f_out % tf == 0:
            return tf
    return f_out  # small / irregular Fout: single full-width block


def _compose(d_f32, start, stop):
    """d[stop-1] @ ... @ d[start] in float32 (wrapper-side, one-time cost)."""
    comp = d_f32[start]
    for l in range(start + 1, stop):
        comp = d_f32[l] @ comp
    return comp


def ufgconv_forward(x, weight, d_stack, filt, bias, lev, *,
                    shrinkage=None, threshold=1e-4,
                    compute_dtype=None, tile_f=None, precompose=None):
    """Fused UFGConv forward, tiled over the output-feature axis.

    compute_dtype=None -> float32 matmuls (module semantics).
    compute_dtype=jnp.bfloat16 -> bf16 MXU matmuls with f32 accumulation at
    stage boundaries.
    """
    orig_dtype = x.dtype
    n, f_in = x.shape
    f_out = weight.shape[1]
    num_d = d_stack.shape[0]
    assert num_d >= 1, "need at least one framelet operator"
    cd = jnp.float32 if compute_dtype is None else compute_dtype

    if tile_f is None:
        tile_f = _default_tile_f(f_out)
    assert f_out % tile_f == 0, "tile_f must divide out_features"
    num_tiles = f_out // tile_f

    rec_start_full = max(lev - 1, 0)

    # Pre-compose the two operator chains into (at most) two N x N matrices
    # whenever the chain would otherwise be re-run per Fout tile (or Fout > N).
    # Composition is done in f32 even on the bf16 path, then cast once.
    if precompose is None:
        precompose = (num_tiles > 1 or f_out > n) and num_d > 1
    if precompose:
        d_f32 = d_stack.astype(jnp.float32)
        ops = [_compose(d_f32, 0, num_d)]                  # decomposition
        if rec_start_full < num_d:
            ops.append(_compose(d_f32, rec_start_full, num_d))  # reconstruction
        d_ops = jnp.stack(ops).astype(d_stack.dtype)
        num_ops, dec_count, rec_start = len(ops), 1, 1
    else:
        d_ops = d_stack
        num_ops, dec_count, rec_start = num_d, num_d, rec_start_full

    # filter[:N] is selected through the BlockSpec window (block (N,1) at row
    # 0); only fall back to a wrapper slice if N is not sublane (8) aligned.
    if filt.shape[0] != n and n % 8 != 0:
        filt = filt[:n]

    bias2d = bias.reshape(1, f_out)

    kernel = functools.partial(_ufgconv_kernel, num_ops, dec_count, rec_start,
                               cd, shrinkage, float(threshold))

    n_chain = dec_count + (num_ops - rec_start)
    flops = 2 * n * f_out * f_in + 2 * n * n * f_out * n_chain
    bytes_accessed = (_nbytes(x) + _nbytes(weight) + _nbytes(d_ops)
                      + _nbytes(filt) + _nbytes(bias2d)
                      + n * f_out * int(jnp.dtype(orig_dtype).itemsize))

    # Generation-aware VMEM budget: query the chip instead of hardcoding.
    try:
        phys_vmem = int(pltpu.get_tpu_info().vmem_capacity_bytes)
    except Exception:
        phys_vmem = 64 * 2**20            # conservative (v7x-sized) fallback
    vmem_cap = (phys_vmem * 7) // 8       # ~56 MiB on v7x, ~112 MiB on v5e/v6e
    # TODO(synk): when the resident operator stack approaches vmem_cap (very
    # large N), keep d_ops in HBM (memory_space=pl.ANY) and stream one [N, N]
    # operator (or row blocks) per chain step with pltpu.emit_pipeline /
    # make_async_copy instead of holding the full stack resident.

    def run(single_buffer_resident):
        item = lambda dt: int(jnp.dtype(dt).itemsize)
        resident = _nbytes(x) + _nbytes(d_ops) + _nbytes(filt)
        tile_bufs = (f_in * tile_f * item(weight.dtype)
                     + tile_f * item(bias2d.dtype)
                     + n * tile_f * item(orig_dtype))
        temporaries = 6 * n * tile_f * 4        # live f32 [N, TF] values
        needed = ((1 if single_buffer_resident else 2) * resident
                  + 2 * tile_bufs + temporaries)
        vmem_limit = int(min(max(int(needed * 1.25), 32 * 2**20), vmem_cap))

        res_kw = {}
        if single_buffer_resident:
            # Grid-invariant inputs (constant index maps): one VMEM buffer is
            # enough; the default double-buffering would only duplicate them.
            res_kw = dict(pipeline_mode=pl.Buffered(1))

        in_specs = [
            pl.BlockSpec((n, f_in), lambda j: (0, 0), **res_kw),          # x
            pl.BlockSpec((f_in, tile_f), lambda j: (0, j)),               # W tile
            pl.BlockSpec((num_ops, n, n), lambda j: (0, 0, 0), **res_kw),  # ops
            pl.BlockSpec((n, 1), lambda j: (0, 0), **res_kw),             # filter[:N]
            pl.BlockSpec((1, tile_f), lambda j: (0, j)),                  # bias tile
        ]
        out_specs = pl.BlockSpec((n, tile_f), lambda j: (0, j))           # lane-dense

        grid_spec = pltpu.PrefetchScalarGridSpec(
            num_scalar_prefetch=0, grid=(num_tiles,),
            in_specs=in_specs, out_specs=out_specs)

        return pl.pallas_call(
            kernel,
            grid_spec=grid_spec,
            out_shape=jax.ShapeDtypeStruct((n, f_out), orig_dtype),
            compiler_params=pltpu.CompilerParams(
                dimension_semantics=("parallel",),
                vmem_limit_bytes=vmem_limit),
            cost_estimate=pl.CostEstimate(
                flops=int(flops), transcendentals=0,
                bytes_accessed=int(bytes_accessed)),
        )(x, weight, d_ops, filt, bias2d)

    try:
        return run(True)
    except Exception:
        # pipeline_mode=pl.Buffered(1) not supported on this jax version:
        # fall back to the default double-buffered pipeline (same numerics).
        return run(False)


def _reference(x, weight, d_stack, filt, bias, lev, shrinkage=None, threshold=1e-4):
    """Pure-JAX mirror of the PyTorch module's forward (chain semantics)."""
    y = x.astype(jnp.float32) @ weight.astype(jnp.float32)
    for l in range(d_stack.shape[0]):
        y = d_stack[l].astype(jnp.float32) @ y
    if shrinkage == "soft":
        y = jnp.sign(y) * jnp.maximum(jnp.abs(y) - threshold, 0.0)
    elif shrinkage == "hard":
        y = jnp.where(jnp.abs(y) > threshold, y, 0.0)
    y = y * filt[: y.shape[0]].astype(jnp.float32)
    for l in range(lev - 1, d_stack.shape[0]):
        y = d_stack[l].astype(jnp.float32) @ y
    return (y + bias.astype(jnp.float32)).astype(x.dtype)


if __name__ == "__main__":
    # Small shapes consistent with the module's __init__ (Fout a multiple of
    # 128 so the output path is lane-dense; Fout=256 -> tile_f=128 -> 2 grid
    # steps for v7x megacore sharding).
    in_features, out_features = 16, 256
    r, Lev, num_nodes = 2, 2, 32

    key = jax.random.PRNGKey(0)
    k_w, k_f, k_x, k_d = jax.random.split(key, 4)

    # Deterministic parameter init mirroring reset_parameters().
    xavier_bound = math.sqrt(6.0 / (in_features + out_features))
    weight = jax.random.uniform(
        k_w, (in_features, out_features), jnp.float32, -xavier_bound, xavier_bound)
    filt = jax.random.uniform(
        k_f, (r * Lev * num_nodes, 1), jnp.float32, 0.9, 1.1)
    bias = jnp.zeros((out_features,), jnp.float32)

    # Synthetic inputs: node features and dense framelet operators.
    x = jax.random.normal(k_x, (num_nodes, in_features), jnp.float32)
    d_stack = jax.random.normal(
        k_d, (r * Lev, num_nodes, num_nodes), jnp.float32) * 0.18

    ref = _reference(x, weight, d_stack, filt, bias, Lev)

    # --- f32 path, pre-composed operator chains (default) -------------------
    out = jax.block_until_ready(
        ufgconv_forward(x, weight, d_stack, filt, bias, Lev))
    assert out.shape == (num_nodes, out_features) and out.dtype == x.dtype
    assert jnp.allclose(out, ref, atol=1e-3, rtol=1e-3), "f32 (composed) mismatch"

    # --- f32 path, uncomposed chain (exercises the per-tile chain codepath) -
    out_c = jax.block_until_ready(
        ufgconv_forward(x, weight, d_stack, filt, bias, Lev, precompose=False))
    assert jnp.allclose(out_c, ref, atol=1e-3, rtol=1e-3), "f32 (chain) mismatch"

    # --- soft-shrinkage path -------------------------------------------------
    out_s = jax.block_until_ready(
        ufgconv_forward(x, weight, d_stack, filt, bias, Lev,
                        shrinkage="soft", threshold=0.1))
    ref_s = _reference(x, weight, d_stack, filt, bias, Lev,
                       shrinkage="soft", threshold=0.1)
    assert jnp.allclose(out_s, ref_s, atol=1e-3, rtol=1e-3), "soft-shrink mismatch"

    # --- bf16 fast path (bf16 MXU operands, f32 stage accumulation) ---------
    out_bf16 = jax.block_until_ready(
        ufgconv_forward(x.astype(jnp.bfloat16), weight,
                        d_stack.astype(jnp.bfloat16), filt, bias, Lev,
                        compute_dtype=jnp.bfloat16))
    assert out_bf16.dtype == jnp.bfloat16
    assert jnp.allclose(out_bf16.astype(jnp.float32), ref, atol=2e-2, rtol=5e-2), \
        "bf16 mismatch vs. f32 reference"

    print("KERNEL_OK")
</pallas_src>

<mosaic_0001>
module attributes {stable_mosaic.version = 11 : i64} {
  func.func @_ufgconv_kernel(%arg0: i32, %arg1: memref<32x16xf32, #tpu.memory_space<vmem>>, %arg2: memref<16x128xf32, #tpu.memory_space<vmem>>, %arg3: memref<2x32x32xf32, #tpu.memory_space<vmem>>, %arg4: memref<32x1xf32, #tpu.memory_space<vmem>>, %arg5: memref<1x128xf32, #tpu.memory_space<vmem>>, %arg6: memref<32x128xf32, #tpu.memory_space<vmem>>) attributes {dimension_semantics = [#tpu.dimension_semantics<parallel>], iteration_bounds = array<i64: 2>, scalar_prefetch = 0 : i64, scratch_operands = 0 : i64, tpu.core_type = #tpu.core_type<tc>, window_params = [{pipeline_mode = #tpu.pipeline_mode<synchronous>, transform_indices = @transform_0, window_bounds = array<i64: 32, 16>}, {transform_indices = @transform_1, window_bounds = array<i64: 16, 128>}, {pipeline_mode = #tpu.pipeline_mode<synchronous>, transform_indices = @transform_2, window_bounds = array<i64: 2, 32, 32>}, {pipeline_mode = #tpu.pipeline_mode<synchronous>, transform_indices = @transform_3, window_bounds = array<i64: 32, 1>}, {transform_indices = @transform_4, window_bounds = array<i64: 1, 128>}, {transform_indices = @transform_5, window_bounds = array<i64: 32, 128>}]} {
    %c0 = arith.constant 0 : index
    %c0_0 = arith.constant 0 : index
    %0 = vector.load %arg1[%c0, %c0_0] : memref<32x16xf32, #tpu.memory_space<vmem>>, vector<32x16xf32>
    %c0_1 = arith.constant 0 : index
    %c0_2 = arith.constant 0 : index
    %1 = vector.load %arg2[%c0_1, %c0_2] : memref<16x128xf32, #tpu.memory_space<vmem>>, vector<16x128xf32>
    %cst = arith.constant dense<0.000000e+00> : vector<32x128xf32>
    %2 = tpu.matmul %0, %1, %cst {dimension_numbers = #tpu.dot_dimension_numbers<[1], [0], [0], [1], [0, 0, 1, 1], [], []>} : vector<32x16xf32>, vector<16x128xf32>, vector<32x128xf32> -> vector<32x128xf32>
    %c0_3 = arith.constant 0 : index
    %c0_4 = arith.constant 0 : index
    %c0_5 = arith.constant 0 : index
    %3 = vector.load %arg3[%c0_3, %c0_4, %c0_5] : memref<2x32x32xf32, #tpu.memory_space<vmem>>, vector<1x32x32xf32>
    %4 = vector.shape_cast %3 : vector<1x32x32xf32> to vector<32x32xf32>
    %cst_6 = arith.constant dense<0.000000e+00> : vector<32x128xf32>
    %5 = tpu.matmul %4, %2, %cst_6 {dimension_numbers = #tpu.dot_dimension_numbers<[1], [0], [0], [1], [0, 0, 1, 1], [], []>} : vector<32x32xf32>, vector<32x128xf32>, vector<32x128xf32> -> vector<32x128xf32>
    %c0_7 = arith.constant 0 : index
    %c0_8 = arith.constant 0 : index
    %6 = vector.load %arg4[%c0_7, %c0_8] : memref<32x1xf32, #tpu.memory_space<vmem>>, vector<32x1xf32>
    %7 = vector.broadcast %6 : vector<32x1xf32> to vector<32x128xf32>
    %8 = arith.mulf %5, %7 : vector<32x128xf32>
    %c1 = arith.constant 1 : index
    %c0_9 = arith.constant 0 : index
    %c0_10 = arith.constant 0 : index
    %9 = vector.load %arg3[%c1, %c0_9, %c0_10] : memref<2x32x32xf32, #tpu.memory_space<vmem>>, vector<1x32x32xf32>
    %10 = vector.shape_cast %9 : vector<1x32x32xf32> to vector<32x32xf32>
    %cst_11 = arith.constant dense<0.000000e+00> : vector<32x128xf32>
    %11 = tpu.matmul %10, %8, %cst_11 {dimension_numbers = #tpu.dot_dimension_numbers<[1], [0], [0], [1], [0, 0, 1, 1], [], []>} : vector<32x32xf32>, vector<32x128xf32>, vector<32x128xf32> -> vector<32x128xf32>
    %c0_12 = arith.constant 0 : index
    %c0_13 = arith.constant 0 : index
    %12 = vector.load %arg5[%c0_12, %c0_13] : memref<1x128xf32, #tpu.memory_space<vmem>>, vector<1x128xf32>
    %13 = vector.broadcast %12 : vector<1x128xf32> to vector<32x128xf32>
    %14 = arith.addf %11, %13 : vector<32x128xf32>
    %c0_14 = arith.constant 0 : index
    %c0_15 = arith.constant 0 : index
    %15 = vector.load %arg6[%c0_14, %c0_15] : memref<32x128xf32, #tpu.memory_space<vmem>>, vector<32x128xf32>
    tpu.vector_store %arg6[%c0_14, %c0_15], %14 {strides = array<i32>} : memref<32x128xf32, #tpu.memory_space<vmem>>, vector<32x128xf32>,
    return
  }
  func.func @transform_0(%arg0: i32) -> (i32, i32) {
    %c0_i32 = arith.constant 0 : i32
    %c0_i32_0 = arith.constant 0 : i32
    %c0_i32_1 = arith.constant 0 : i32
    return %c0_i32, %c0_i32_0 : i32, i32
  }
  func.func @transform_1(%arg0: i32) -> (i32, i32) {
    %c0_i32 = arith.constant 0 : i32
    %c0_i32_0 = arith.constant 0 : i32
    return %c0_i32, %arg0 : i32, i32
  }
  func.func @transform_2(%arg0: i32) -> (i32, i32, i32) {
    %c0_i32 = arith.constant 0 : i32
    %c0_i32_0 = arith.constant 0 : i32
    %c0_i32_1 = arith.constant 0 : i32
    %c0_i32_2 = arith.constant 0 : i32
    return %c0_i32, %c0_i32_0, %c0_i32_1 : i32, i32, i32
  }
  func.func @transform_3(%arg0: i32) -> (i32, i32) {
    %c0_i32 = arith.constant 0 : i32
    %c0_i32_0 = arith.constant 0 : i32
    %c0_i32_1 = arith.constant 0 : i32
    return %c0_i32, %c0_i32_0 : i32, i32
  }
  func.func @transform_4(%arg0: i32) -> (i32, i32) {
    %c0_i32 = arith.constant 0 : i32
    %c0_i32_0 = arith.constant 0 : i32
    return %c0_i32, %arg0 : i32, i32
  }
  func.func @transform_5(%arg0: i32) -> (i32, i32) {
    %c0_i32 = arith.constant 0 : i32
    %c0_i32_0 = arith.constant 0 : i32
    return %c0_i32, %arg0 : i32, i32
  }
}

module attributes {stable_mosaic.version = 11 : i64} {
  func.func @_ufgconv_kernel(%arg0: i32, %arg1: memref<32x16xf32, #tpu.memory_space<vmem>>, %arg2: memref<16x128xf32, #tpu.memory_space<vmem>>, %arg3: memref<2x32x32xf32, #tpu.memory_space<vmem>>, %arg4: memref<32x1xf32, #tpu.memory_space<vmem>>, %arg5: memref<1x128xf32, #tpu.memory_space<vmem>>, %arg6: memref<32x128xf32, #tpu.memory_space<vmem>>) attributes {dimension_semantics = [#tpu.dimension_semantics<parallel>], iteration_bounds = array<i64: 2>, scalar_prefetch = 0 : i64, scratch_operands = 0 : i64, tpu.core_type = #tpu.core_type<tc>, window_params = [{pipeline_mode = #tpu.pipeline_mode<synchronous>, transform_indices = @transform_0, window_bounds = array<i64: 32, 16>}, {transform_indices = @transform_1, window_bounds = array<i64: 16, 128>}, {pipeline_mode = #tpu.pipeline_mode<synchronous>, transform_indices = @transform_2, window_bounds = array<i64: 2, 32, 32>}, {transform_indices = @transform_3, window_bounds = array<i64: 32, 1>}, {transform_indices = @transform_4, window_bounds = array<i64: 1, 128>}, {transform_indices = @transform_5, window_bounds = array<i64: 32, 128>}]} {
    %c0 = arith.constant 0 : index
    %c0_0 = arith.constant 0 : index
    %0 = vector.load %arg1[%c0, %c0_0] : memref<32x16xf32, #tpu.memory_space<vmem>>, vector<32x16xf32>
    %c0_1 = arith.constant 0 : index
    %c0_2 = arith.constant 0 : index
    %1 = vector.load %arg2[%c0_1, %c0_2] : memref<16x128xf32, #tpu.memory_space<vmem>>, vector<16x128xf32>
    %cst = arith.constant dense<0.000000e+00> : vector<32x128xf32>
    %2 = tpu.matmul %0, %1, %cst {dimension_numbers = #tpu.dot_dimension_numbers<[1], [0], [0], [1], [0, 0, 1, 1], [], []>} : vector<32x16xf32>, vector<16x128xf32>, vector<32x128xf32> -> vector<32x128xf32>
    %c0_3 = arith.constant 0 : index
    %c0_4 = arith.constant 0 : index
    %c0_5 = arith.constant 0 : index
    %3 = vector.load %arg3[%c0_3, %c0_4, %c0_5] : memref<2x32x32xf32, #tpu.memory_space<vmem>>, vector<1x32x32xf32>
    %4 = vector.shape_cast %3 : vector<1x32x32xf32> to vector<32x32xf32>
    %cst_6 = arith.constant dense<0.000000e+00> : vector<32x128xf32>
    %5 = tpu.matmul %4, %2, %cst_6 {dimension_numbers = #tpu.dot_dimension_numbers<[1], [0], [0], [1], [0, 0, 1, 1], [], []>} : vector<32x32xf32>, vector<32x128xf32>, vector<32x128xf32> -> vector<32x128xf32>
    %c0_7 = arith.constant 0 : index
    %c0_8 = arith.constant 0 : index
    %6 = vector.load %arg4[%c0_7, %c0_8] : memref<32x1xf32, #tpu.memory_space<vmem>>, vector<32x1xf32>
    %7 = vector.broadcast %6 : vector<32x1xf32> to vector<32x128xf32>
    %8 = arith.mulf %5, %7 : vector<32x128xf32>
    %c1 = arith.constant 1 : index
    %c0_9 = arith.constant 0 : index
    %c0_10 = arith.constant 0 : index
    %9 = vector.load %arg3[%c1, %c0_9, %c0_10] : memref<2x32x32xf32, #tpu.memory_space<vmem>>, vector<1x32x32xf32>
    %10 = vector.shape_cast %9 : vector<1x32x32xf32> to vector<32x32xf32>
    %cst_11 = arith.constant dense<0.000000e+00> : vector<32x128xf32>
    %11 = tpu.matmul %10, %8, %cst_11 {dimension_numbers = #tpu.dot_dimension_numbers<[1], [0], [0], [1], [0, 0, 1, 1], [], []>} : vector<32x32xf32>, vector<32x128xf32>, vector<32x128xf32> -> vector<32x128xf32>
    %c0_12 = arith.constant 0 : index
    %c0_13 = arith.constant 0 : index
    %12 = vector.load %arg5[%c0_12, %c0_13] : memref<1x128xf32, #tpu.memory_space<vmem>>, vector<1x128xf32>
    %13 = vector.broadcast %12 : vector<1x128xf32> to vector<32x128xf32>
    %14 = arith.addf %11, %13 : vector<32x128xf32>
    %c0_14 = arith.constant 0 : index
    %c0_15 = arith.constant 0 : index
    %15 = vector.load %arg6[%c0_14, %c0_15] : memref<32x128xf32, #tpu.memory_space<vmem>>, vector<32x128xf32>
    tpu.vector_store %arg6[%c0_14, %c0_15], %14 {strides = array<i32>} : memref<32x128xf32, #tpu.memory_space<vmem>>, vector<32x128xf32>,
    return
  }
  func.func @transform_0(%arg0: i32) -> (i32, i32) {
    %c0_i32 = arith.constant 0 : i32
    %c0_i32_0 = arith.constant 0 : i32
    %c0_i32_1 = arith.constant 0 : i32
    return %c0_i32, %c0_i32_0 : i32, i32
  }
  func.func @transform_1(%arg0: i32) -> (i32, i32) {
    %c0_i32 = arith.constant 0 : i32
    %c0_i32_0 = arith.constant 0 : i32
    return %c0_i32, %arg0 : i32, i32
  }
  func.func @transform_2(%arg0: i32) -> (i32, i32, i32) {
    %c0_i32 = arith.constant 0 : i32
    %c0_i32_0 = arith.constant 0 : i32
    %c0_i32_1 = arith.constant 0 : i32
    %c0_i32_2 = arith.constant 0 : i32
    return %c0_i32, %c0_i32_0, %c0_i32_1 : i32, i32, i32
  }
  func.func @transform_3(%arg0: i32) -> (i32, i32) {
    %c0_i32 = arith.constant 0 : i32
    %c0_i32_0 = arith.constant 0 : i32
    %c0_i32_1 = arith.constant 0 : i32
    return %c0_i32, %c0_i32_0 : i32, i32
  }
  func.func @transform_4(%arg0: i32) -> (i32, i32) {
    %c0_i32 = arith.constant 0 : i32
    %c0_i32_0 = arith.constant 0 : i32
    return %c0_i32, %arg0 : i32, i32
  }
  func.func @transform_5(%arg0: i32) -> (i32, i32) {
    %c0_i32 = arith.constant 0 : i32
    %c0_i32_0 = arith.constant 0 : i32
    return %c0_i32, %arg0 : i32, i32
  }
}

</mosaic_0001>

<bundles_post_ra>
// kernel: tpu_custom_call.1
= control target key start
LH: loop header
LB: loop body
LE: loop exit
PB: predicated region body
PF: predicated region fallthrough
CT: control target
= control target key end

     0   :  { %10 = vsyncpa [#allocation4], 0  ;;  %s1138_s0 = inlined_call_operand.vmem [shape: f32[32,16], index: 0, kind: input, shape index: {}]   ;;  %s1139_s1 = inlined_call_operand.vmem [shape: f32[16,256], index: 1, kind: input, shape index: {}]   ;;  %s1140_s2 = inlined_call_operand.vmem [shape: f32[2,32,32], index: 2, kind: input, shape index: {}]   ;;  %s1141_s3 = inlined_call_operand.vmem [shape: f32[128,1], index: 3, kind: input, shape index: {}]   ;;  %s1142_s4 = inlined_call_operand.vmem [shape: f32[1,256], index: 4, kind: input, shape index: {}]   ;;  %s1143_s5 = inlined_call_operand.hbm [shape: f32[32,256], index: 5, kind: output, shape index: {}]  }
   0x1   :  { %12 = vsyncpa [#allocation4 + $0x1], 0  ;;  %s965_s18 = smov 0   ;;  %s967_s19 = smov 0  }
   0x2   :  { %s969_s20 = smov 0   ;;  %s971_s21 = smov 0  }
   0x3 LB: > { %s986_s22 = sadd.s32 4294967295, %s928_s21   ;;  %s712_s23 = sadd.s32 4294967294, %s928_s21   ;;  %s928_s21 = sphi %s971_s21, %s1149_s21   ;;  %s924_s20 = sphi %s969_s20, %s1148_s20   ;;  %s920_s19 = sphi %s967_s19, %s1147_s19   ;;  %s916_s18 = sphi %s965_s18, %s1146_s18  }
   0x4   : > { %s990_s24 = sadd.s32 1, %s928_s21   ;;  %s46_s25 = sadd.s32 1, %s924_s20 }
   0x5   : > { %s43_s26 = ssub.s32 %s928_s21, %s990_s24  ;;  %p53_p0 = scmp.ne.s32.totalorder %s924_s20, %s920_s19 }
   0x6   : > { %p44_p1 = scmp.eq.s32.totalorder %s43_s26, 0  ;;  %p54_p2 = scmp.eq.s32.totalorder %s928_s21, 0 }
   0x7   : > { %p151_p3 = scmp.eq.s32.totalorder %s986_s22, 1  ;;  %p156_p4 = scmp.ne.s32.totalorder %s920_s19, %s916_s18 }
   0x8   : > { %s1002_s27 = scalar_select %p44_p1, %s924_s20, %s46_s25  }
   0x9   : > { %p55_p5 = por %p54_p2, %p53_p0  ;;  %p1004_p6 = por %p151_p3, %p53_p0 }
   0xa   : > { %p157_p7 = scmp.eq.s32.totalorder %s712_s23, 1  ;;  %p714_p9 = scmp.ge.s32.totalorder %s928_s21, 2 }
   0xc   : > { %p1008_p8 = por %p157_p7, %p156_p4  ;;  %182 = sbr.rel (%p714_p9) target bundleno = 26 (0x1a), region = 28 }
  0x13   : > { %185 = sbr.rel (!%p55_p5) target bundleno = 26 (0x1a), region = 32  ;;  %s187_s30 = sand.u32 (%p55_p5), 1, %s924_s20  }
  0x14   : > { %s716_s6 = sshll.u32 (%p55_p5), %s928_s21, 3  ;;  %s715_s7 = sshll.u32 (%p55_p5), %s187_s30, 4 }
  0x15   : > { %s191_s10 = scalar_lea.vmem (%p55_p5), %s1139_s1, %s716_s6  ;;  %s189_s11 = scalar_lea.vmem (%p55_p5), [#allocation2], %s715_s7 }
  0x16   : > { %v221_v0 = vld [vmem:[%s191_s10] sm:$0xff] (%p55_p5)  ;;  %v223_v1 = vld [vmem:[%s191_s10 + $0x10] sm:$0xff] (%p55_p5) }
  0x17   : > { %222 = vst [vmem:[%s189_s11] sm:$0xff] (%p55_p5), %v221_v0  ;;  %224 = vst [vmem:[%s189_s11 + $0x8] sm:$0xff] (%p55_p5), %v223_v1 }
  0x1a PF: > { %p717_p10 = scmp.ge.s32.totalorder %s928_s21, 1  ;;  %p235_p11 = scmp.lt.s32.totalorder %s928_s21, 3 }
  0x1c   : > { %p236_p12 = pnand %p717_p10, %p235_p11 }
  0x1d   : > { %s1023_s12 = sand.u32 (!%p236_p12), 1, %s920_s19   ;;  %v275_v2 = vld [vmem:[%s1138_s0] sm:$0xff] (!%p236_p12)  ;;  %vm281_vm0 = vcmask (!%p236_p12), 130048   ;;  %v276_v6 = vld [vmem:[%s1138_s0 + $0x8] sm:$0xff] (!%p236_p12)  ;;  %v277_v7 = vld [vmem:[%s1138_s0 + $0x10] sm:$0xff] (!%p236_p12)  ;;  %vm383_vm1 = vcmask (!%p236_p12), 261120  }
  0x1e   : > { %239 = sbr.rel (%p236_p12) target bundleno = 722 (0x2d2), region = 74  ;;  %s718_s15 = sshll.u32 (!%p236_p12), %s1023_s12, 4  ;;  %767 = vmatprep.mubr.msk.f32.mxu0 (!%p236_p12), %vm281_vm0, %v275_v2  ;;  %v278_v8 = vld [vmem:[%s1138_s0 + $0x18] sm:$0xff] (!%p236_p12)  ;;  %v379_v9 = vld [vmem:[%s1140_s2] sm:$0xff] (!%p236_p12)  ;;  %v483_v11 = vld [vmem:[%s1141_s3 + $0x10] sm:$0xff] (!%p236_p12)  ;;  %v930_v12 = vmov (!%p236_p12), 0  }
  0x1f   : > { %s244_s16 = scalar_lea.vmem (!%p236_p12), [#allocation2], %s718_s15  ;;  %781 = vmatprep.mubr.msk.f32.mxu1 (!%p236_p12), %vm383_vm1, %v379_v9  ;;  %v481_v10 = vld [vmem:[%s1141_s3] sm:$0xff] (!%p236_p12)  ;;  %864 = vset.pattern.permute.xlu0 (!%p236_p12), %v930_v12  ;;  %v482_v13 = vld [vmem:[%s1141_s3 + $0x8] sm:$0xff] (!%p236_p12)  ;;  %v484_v14 = vld [vmem:[%s1141_s3 + $0x18] sm:$0xff] (!%p236_p12)  ;;  %p272_p13 = scmp.lt.s32.totalorder (!%p236_p12), %s986_s22, 1 }
  0x20   : > { %v279_v3 = vld [vmem:[%s244_s16] sm:$0xff] (!%p236_p12)  ;;  %v280_v4 = vld [vmem:[%s244_s16 + $0x8] sm:$0xff] (!%p236_p12)  ;;  %865 = vset.pattern.permute.xlu1 (!%p236_p12), %v930_v12  ;;  %487 = vperm.xlu0 (!%p236_p12), %864, %v481_v10   ;;  %s719_s30 = sshll.u32 (!%p236_p12), %s1023_s12, 5  ;;  %s738_s8 = sshll.u32 (!%p236_p12), %s986_s22, 7 }
  0x21   : > { %v801_v5 = vpack.c.bf16 (!%p236_p12), %v280_v4, %v279_v3  ;;  %497 = vperm.xlu1 (!%p236_p12), %865, %v483_v11   ;;  %v380_v21 = vld [vmem:[%s1140_s2 + $0x8] sm:$0xff] (!%p236_p12)  ;;  %v381_v22 = vld [vmem:[%s1140_s2 + $0x10] sm:$0xff] (!%p236_p12)  ;;  %v382_v23 = vld [vmem:[%s1140_s2 + $0x18] sm:$0xff] (!%p236_p12)  ;;  %s271_s6 = scalar_lea.vmem (!%p236_p12), [#allocation3], %s719_s30  ;;  %s1094_s11 = scalar_lea.hbm (!%p236_p12), %s1143_s5, %s738_s8 }
  0x22   : > { %v728_v24 = vld [vmem:[%s1140_s2 + $0x20] sm:$0xff] (!%p236_p12)  ;;  %v729_v39 = vld [vmem:[%s1140_s2 + $0x28] sm:$0xff] (!%p236_p12)  ;;  %v730_v40 = vld [vmem:[%s1140_s2 + $0x30] sm:$0xff] (!%p236_p12)  ;;  %s635_s7 = sshll.u32 (!%p236_p12), %s271_s6, 4  ;;  %s623_s13 = scalar_lea.sflag (!%p236_p12), [#allocation4], %s1023_s12  ;;  %s1089_s7 = int_to_ptr.vmem [resolvable:$true] %s635_s7 }
  0x23   : > { %802 = vmatprep.subr.bf16.mxu0 (!%p236_p12), %v801_v5  ;;  %v731_v41 = vld [vmem:[%s1140_s2 + $0x38] sm:$0xff] (!%p236_p12)  ;;  %s931_s14 = smov (!%p236_p12), [#allocation3]  }
  0x24   : > { %804 = vmatpush3.bf16.msra.mxu0 (!%p236_p12), %v801_v5  ;;  %492 = vperm.xlu0 (!%p236_p12), %864, %v482_v13   ;;  %s870_s15 = sshll.u32 (!%p236_p12), %s931_s14, 4  ;;  %s871_s15 = int_to_ptr.vmem [resolvable:$false] %s870_s15 }
  0x25   : > { %502 = vperm.xlu1 %865, %v484_v14   ;;  %s273_s17 = scalar_select %p272_p13, %s986_s22, 1 }
  0x26   : > { %s866_s22 = scalar_lea.vmem %s1089_s7, 512  ;;  %s872_s16 = scalar_lea.vmem %s871_s15, 1024 }
  0x27   : > { %768 = vmatmul.mubr.msk.f32.vlgmr.msra.gmra.mrb[0].mxu0 %vm281_vm0, %v276_v6  ;;  %s274_s26 = scalar_lea.vmem %s1142_s4, %s273_s17  ;;  %p867_p0 = scmp.ne.s32.totalorder %s1089_s7, %s866_s22 }
  0x28   : > { %770 = vmatprep.mubr.msk.f32.mxu0 %vm281_vm0, %v277_v7  ;;  %v732_v42 = vld [vmem:[%s274_s26] ss:$0 sm:$0xff]  ;;  %p873_p3 = scmp.lt.s32.totalorder %s1089_s7, %s871_s15  ;;  %p874_p4 = scmp.lt.s32.totalorder %s872_s16, %s866_s22 }
  0x29   : > { %p868_p1 = pnand %p867_p0, %p1004_p6 }
  0x2a   : > { %p875_p5 = por %p874_p4, %p873_p3 }
  0x2b   : > { %771 = vmatmul.mubr.msk.f32.gmra.mrb[2].mxu0 %vm281_vm0, %v278_v8  ;;  %p869_p2 = pneg %p868_p1 }
  0x2c   : > { %795 = vmatprep.mubr.msk.f32.mxu0 %vm383_vm1, %v728_v24 }
  0x2d   : > { %p876_p7 = pnand %p875_p5, %p869_p2 }
  0x9f   : > { %v488_v25 = vpop.permute.xlu0 %487 }
  0xa0   : > { %v498_v26 = vpop.permute.xlu1 %497 }
  0xa3   : > { %v493_v27 = vpop.permute.xlu0 %492 }
  0xa4   : > { %v503_v32 = vpop.permute.xlu1 %502 }
  0xfa   : > { %v769_v15 = vpop.f32.mrb[0].mxu0 }
  0xfb   : > { %v360_v16 = vpop.f32.mrb[1].mxu0 }
  0xfc   : > { %v805_v17 = vpack.c.bf16 %v769_v15, %v360_v16 }
  0xfe   : > { %v772_v18 = vpop.f32.mrb[2].mxu0  ;;  %806 = vmatprep.subr.bf16.mxu1 %v805_v17 }
  0xff   : > { %v370_v19 = vpop.f32.mrb[3].mxu0  ;;  %808 = vmatpush3.bf16.msra.mxu1 %v805_v17 }
 0x100   : > { %v809_v20 = vpack.c.bf16 %v772_v18, %v370_v19 }
 0x102   : > { %810 = vmatprep.subr.bf16.mxu1 %v809_v20 }
 0x103   : > { %812 = vmatpush3.bf16.msra.mxu1 %v809_v20 }
 0x106   : > { %782 = vmatmul.mubr.msk.f32.vlgmr.msra.gmra.mrb[0].mxu1 %vm383_vm1, %v380_v21 }
 0x107   : > { %784 = vmatprep.mubr.msk.f32.mxu1 %vm383_vm1, %v381_v22 }
 0x10a   : > { %785 = vmatmul.mubr.msk.f32.gmra.mrb[2].mxu1 %vm383_vm1, %v382_v23 }
 0x1d9   : > { %v783_v28 = vpop.f32.mrb[0].mxu1 }
 0x1da   : > { %v506_v29 = vmul.f32 %v783_v28, %v493_v27  ;;  %v462_v30 = vpop.f32.mrb[1].mxu1 }
 0x1db   : > { %v505_v31 = vmul.f32 %v488_v25, %v462_v30 }
 0x1dd   : > { %v813_v33 = vpack.c.bf16 %v506_v29, %v505_v31  ;;  %v786_v34 = vpop.f32.mrb[2].mxu1 }
 0x1de   : > { %v508_v35 = vmul.f32 %v786_v34, %v503_v32  ;;  %v472_v36 = vpop.f32.mrb[3].mxu1 }
 0x1df   : > { %v507_v37 = vmul.f32 %v498_v26, %v472_v36  ;;  %814 = vmatprep.subr.bf16.mxu0 %v813_v33 }
 0x1e0   : > { %816 = vmatpush3.bf16.msra.mxu0 %v813_v33 }
 0x1e1   : > { %v817_v38 = vpack.c.bf16 %v508_v35, %v507_v37 }
 0x1e3   : > { %818 = vmatprep.subr.bf16.mxu0 %v817_v38 }
 0x1e4   : > { %820 = vmatpush3.bf16.msra.mxu0 %v817_v38 }
 0x1e7   : > { %796 = vmatmul.mubr.msk.f32.vlgmr.msra.gmra.mrb[4].mxu0 %vm383_vm1, %v729_v39 }
 0x1e8   : > { %798 = vmatprep.mubr.msk.f32.mxu0 %vm383_vm1, %v730_v40 }
 0x1eb   : > { %799 = vmatmul.mubr.msk.f32.gmra.mrb[6].mxu0 %vm383_vm1, %v731_v41 }
 0x2ba   : > { %v797_v43 = vpop.f32.mrb[4].mxu0 }
 0x2bb   : > { %v605_v44 = vadd.f32 %v797_v43, %v732_v42  ;;  %v599_v45 = vpop.f32.mrb[5].mxu0 }
 0x2bc   : > { %v600_v46 = vadd.f32 %v732_v42, %v599_v45 }
 0x2bd   : > { %619 = vst [vmem:[%s271_s6 + $0x8] sm:$0xff] %v605_v44 }
 0x2be   : > { %618 = vst [vmem:[%s271_s6] sm:$0xff] %v600_v46  ;;  %v800_v47 = vpop.f32.mrb[6].mxu0 }
 0x2bf   : > { %v615_v48 = vadd.f32 %v800_v47, %v732_v42  ;;  %v609_v49 = vpop.f32.mrb[7].mxu0 }
 0x2c0   : > { %v610_v50 = vadd.f32 %v732_v42, %v609_v49 }
 0x2c1   : > { %621 = vst [vmem:[%s271_s6 + $0x18] sm:$0xff] %v615_v48 }
 0x2c2   : > { %620 = vst [vmem:[%s271_s6 + $0x10] sm:$0xff] %v610_v50 }
 0x2c3   : > { %879 = shalt.err (!%p876_p7)
}
 0x2c4   : > { %s880_s17 = scalar_lea.hbm %s1094_s11, 512  ;;  %s884_s26 = scalar_lea.hbm %s1143_s5, 1024 }
 0x2c5   : > { %p881_p10 = scmp.ne.s32.totalorder %s1094_s11, %s880_s17  ;;  %p885_p13 = scmp.lt.u32.totalorder %s1094_s11, %s1143_s5 }
 0x2c6   : > { %p886_p0 = scmp.lt.u32.totalorder %s884_s26, %s880_s17  ;;  %p888_p2 = scmp.lt.u32.totalorder %s880_s17, %s1094_s11 }
 0x2c7   : > { %p882_p11 = pnand %p881_p10, %p1004_p6 }
 0x2c8   : > { %p887_p1 = por %p886_p0, %p885_p13 }
 0x2c9   : > { %p883_p12 = pneg %p882_p11 }
 0x2ca   : > { %p889_p3 = por %p888_p2, %p887_p1 }
 0x2cc   : > { %p890_p4 = pnand %p889_p3, %p883_p12 }
 0x2ce   : > { %893 = shalt.err (!%p890_p4)
}
 0x2cf   : > { %s932_s8 = smov 128   ;;  %s933_s9 = smov 256  }
 0x2d0   : > { %s934_s10 = smov 8  }
 0x2d1   : > { %821 = dma.vmem_to_hbm [thread:$0]  (%p1004_p6), %s1089_s7, 512, %s1094_s11, %s623_s13, %s932_s8, %s933_s9, %s934_s10  }
 0x2d2 PF: > { %s650_s22 = sand.u32 1, %s916_s18   ;;  %p824_p5 = pnand %p714_p9, %p1008_p8 }
 0x2d3   : > { %s651_s14 = scalar_lea.sflag [#allocation4], %s650_s22 }
 0x2d4   : > { %911 = dma.done.wait (!%p824_p5), %s651_s14, 512  }
 0x2d5   : > { %913 = vsyncadd (!%p824_p5), %s651_s14, 4294966784  ;;  %p15_p7 = scmp.ge.s32.totalorder %s990_s24, 4   ;;  %s1146_s18 = smov %s920_s19 }
 0x2d6   : > { %s1147_s19 = smov %s924_s20  ;;  %s1148_s20 = smov %s1002_s27 }
 0x2d7   : > { %s1149_s21 = smov %s990_s24  ;;  %17 = sbr.rel (!%p15_p7) target bundleno = 3 (0x3), region = 122 }
 0x2de   :  { %656 = vsyncpa [#allocation4], 1 }
 0x2df   :  { %658 = vsyncpa [#allocation4 + $0x1], 1 }

// kernel: tpu_custom_call.1
= control target key start
LH: loop header
LB: loop body
LE: loop exit
PB: predicated region body
PF: predicated region fallthrough
CT: control target
= control target key end

     0   :  { %10 = vsyncpa [#allocation4], 0  ;;  %s1138_s0 = inlined_call_operand.vmem [shape: f32[32,16], index: 0, kind: input, shape index: {}]   ;;  %s1139_s1 = inlined_call_operand.vmem [shape: f32[16,256], index: 1, kind: input, shape index: {}]   ;;  %s1140_s2 = inlined_call_operand.vmem [shape: f32[2,32,32], index: 2, kind: input, shape index: {}]   ;;  %s1141_s3 = inlined_call_operand.vmem [shape: f32[128,1], index: 3, kind: input, shape index: {}]   ;;  %s1142_s4 = inlined_call_operand.vmem [shape: f32[1,256], index: 4, kind: input, shape index: {}]   ;;  %s1143_s5 = inlined_call_operand.hbm [shape: f32[32,256], index: 5, kind: output, shape index: {}]  }
   0x1   :  { %12 = vsyncpa [#allocation4 + $0x1], 0  ;;  %s965_s18 = smov 0   ;;  %s967_s19 = smov 0  }
   0x2   :  { %s969_s20 = smov 0   ;;  %s971_s21 = smov 0  }
   0x3 LB: > { %s986_s22 = sadd.s32 4294967295, %s928_s21   ;;  %s712_s23 = sadd.s32 4294967294, %s928_s21   ;;  %s928_s21 = sphi %s971_s21, %s1149_s21   ;;  %s924_s20 = sphi %s969_s20, %s1148_s20   ;;  %s920_s19 = sphi %s967_s19, %s1147_s19   ;;  %s916_s18 = sphi %s965_s18, %s1146_s18  }
   0x4   : > { %s990_s24 = sadd.s32 1, %s928_s21   ;;  %s46_s25 = sadd.s32 1, %s924_s20 }
   0x5   : > { %s43_s26 = ssub.s32 %s928_s21, %s990_s24  ;;  %p53_p0 = scmp.ne.s32.totalorder %s924_s20, %s920_s19 }
   0x6   : > { %p44_p1 = scmp.eq.s32.totalorder %s43_s26, 0  ;;  %p54_p2 = scmp.eq.s32.totalorder %s928_s21, 0 }
   0x7   : > { %p151_p3 = scmp.eq.s32.totalorder %s986_s22, 1  ;;  %p156_p4 = scmp.ne.s32.totalorder %s920_s19, %s916_s18 }
   0x8   : > { %s1002_s27 = scalar_select %p44_p1, %s924_s20, %s46_s25  }
   0x9   : > { %p55_p5 = por %p54_p2, %p53_p0  ;;  %p1004_p6 = por %p151_p3, %p53_p0 }
   0xa   : > { %p157_p7 = scmp.eq.s32.totalorder %s712_s23, 1  ;;  %p714_p9 = scmp.ge.s32.totalorder %s928_s21, 2 }
   0xc   : > { %p1008_p8 = por %p157_p7, %p156_p4  ;;  %182 = sbr.rel (%p714_p9) target bundleno = 26 (0x1a), region = 28 }
  0x13   : > { %185 = sbr.rel (!%p55_p5) target bundleno = 26 (0x1a), region = 32  ;;  %s187_s30 = sand.u32 (%p55_p5), 1, %s924_s20  }
  0x14   : > { %s716_s6 = sshll.u32 (%p55_p5), %s928_s21, 3  ;;  %s715_s7 = sshll.u32 (%p55_p5), %s187_s30, 4 }
  0x15   : > { %s191_s10 = scalar_lea.vmem (%p55_p5), %s1139_s1, %s716_s6  ;;  %s189_s11 = scalar_lea.vmem (%p55_p5), [#allocation2], %s715_s7 }
  0x16   : > { %v221_v0 = vld [vmem:[%s191_s10] sm:$0xff] (%p55_p5)  ;;  %v223_v1 = vld [vmem:[%s191_s10 + $0x10] sm:$0xff] (%p55_p5) }
  0x17   : > { %222 = vst [vmem:[%s189_s11] sm:$0xff] (%p55_p5), %v221_v0  ;;  %224 = vst [vmem:[%s189_s11 + $0x8] sm:$0xff] (%p55_p5), %v223_v1 }
  0x1a PF: > { %p717_p10 = scmp.ge.s32.totalorder %s928_s21, 1  ;;  %p235_p11 = scmp.lt.s32.totalorder %s928_s21, 3 }
  0x1c   : > { %p236_p12 = pnand %p717_p10, %p235_p11 }
  0x1d   : > { %s1023_s12 = sand.u32 (!%p236_p12), 1, %s920_s19   ;;  %v275_v2 = vld [vmem:[%s1138_s0] sm:$0xff] (!%p236_p12)  ;;  %vm281_vm0 = vcmask (!%p236_p12), 130048   ;;  %v276_v6 = vld [vmem:[%s1138_s0 + $0x8] sm:$0xff] (!%p236_p12)  ;;  %v277_v7 = vld [vmem:[%s1138_s0 + $0x10] sm:$0xff] (!%p236_p12)  ;;  %vm383_vm1 = vcmask (!%p236_p12), 261120  }
  0x1e   : > { %239 = sbr.rel (%p236_p12) target bundleno = 722 (0x2d2), region = 74  ;;  %s718_s15 = sshll.u32 (!%p236_p12), %s1023_s12, 4  ;;  %767 = vmatprep.mubr.msk.f32.mxu0 (!%p236_p12), %vm281_vm0, %v275_v2  ;;  %v278_v8 = vld [vmem:[%s1138_s0 + $0x18] sm:$0xff] (!%p236_p12)  ;;  %v379_v9 = vld [vmem:[%s1140_s2] sm:$0xff] (!%p236_p12)  ;;  %v483_v11 = vld [vmem:[%s1141_s3 + $0x10] sm:$0xff] (!%p236_p12)  ;;  %v930_v12 = vmov (!%p236_p12), 0  }
  0x1f   : > { %s244_s16 = scalar_lea.vmem (!%p236_p12), [#allocation2], %s718_s15  ;;  %781 = vmatprep.mubr.msk.f32.mxu1 (!%p236_p12), %vm383_vm1, %v379_v9  ;;  %v481_v10 = vld [vmem:[%s1141_s3] sm:$0xff] (!%p236_p12)  ;;  %864 = vset.pattern.permute.xlu0 (!%p236_p12), %v930_v12  ;;  %v482_v13 = vld [vmem:[%s1141_s3 + $0x8] sm:$0xff] (!%p236_p12)  ;;  %v484_v14 = vld [vmem:[%s1141_s3 + $0x18] sm:$0xff] (!%p236_p12)  ;;  %p272_p13 = scmp.lt.s32.totalorder (!%p236_p12), %s986_s22, 1 }
  0x20   : > { %v279_v3 = vld [vmem:[%s244_s16] sm:$0xff] (!%p236_p12)  ;;  %v280_v4 = vld [vmem:[%s244_s16 + $0x8] sm:$0xff] (!%p236_p12)  ;;  %865 = vset.pattern.permute.xlu1 (!%p236_p12), %v930_v12  ;;  %487 = vperm.xlu0 (!%p236_p12), %864, %v481_v10   ;;  %s719_s30 = sshll.u32 (!%p236_p12), %s1023_s12, 5  ;;  %s738_s8 = sshll.u32 (!%p236_p12), %s986_s22, 7 }
  0x21   : > { %v801_v5 = vpack.c.bf16 (!%p236_p12), %v280_v4, %v279_v3  ;;  %497 = vperm.xlu1 (!%p236_p12), %865, %v483_v11   ;;  %v380_v21 = vld [vmem:[%s1140_s2 + $0x8] sm:$0xff] (!%p236_p12)  ;;  %v381_v22 = vld [vmem:[%s1140_s2 + $0x10] sm:$0xff] (!%p236_p12)  ;;  %v382_v23 = vld [vmem:[%s1140_s2 + $0x18] sm:$0xff] (!%p236_p12)  ;;  %s271_s6 = scalar_lea.vmem (!%p236_p12), [#allocation3], %s719_s30  ;;  %s1094_s11 = scalar_lea.hbm (!%p236_p12), %s1143_s5, %s738_s8 }
  0x22   : > { %v728_v24 = vld [vmem:[%s1140_s2 + $0x20] sm:$0xff] (!%p236_p12)  ;;  %v729_v39 = vld [vmem:[%s1140_s2 + $0x28] sm:$0xff] (!%p236_p12)  ;;  %v730_v40 = vld [vmem:[%s1140_s2 + $0x30] sm:$0xff] (!%p236_p12)  ;;  %s635_s7 = sshll.u32 (!%p236_p12), %s271_s6, 4  ;;  %s623_s13 = scalar_lea.sflag (!%p236_p12), [#allocation4], %s1023_s12  ;;  %s1089_s7 = int_to_ptr.vmem [resolvable:$true] %s635_s7 }
  0x23   : > { %802 = vmatprep.subr.bf16.mxu0 (!%p236_p12), %v801_v5  ;;  %v731_v41 = vld [vmem:[%s1140_s2 + $0x38] sm:$0xff] (!%p236_p12)  ;;  %s931_s14 = smov (!%p236_p12), [#allocation3]  }
  0x24   : > { %804 = vmatpush3.bf16.msra.mxu0 (!%p236_p12), %v801_v5  ;;  %492 = vperm.xlu0 (!%p236_p12), %864, %v482_v13   ;;  %s870_s15 = sshll.u32 (!%p236_p12), %s931_s14, 4  ;;  %s871_s15 = int_to_ptr.vmem [resolvable:$false] %s870_s15 }
  0x25   : > { %502 = vperm.xlu1 %865, %v484_v14   ;;  %s273_s17 = scalar_select %p272_p13, %s986_s22, 1 }
  0x26   : > { %s866_s22 = scalar_lea.vmem %s1089_s7, 512  ;;  %s872_s16 = scalar_lea.vmem %s871_s15, 1024 }
  0x27   : > { %768 = vmatmul.mubr.msk.f32.vlgmr.msra.gmra.mrb[0].mxu0 %vm281_vm0, %v276_v6  ;;  %s274_s26 = scalar_lea.vmem %s1142_s4, %s273_s17  ;;  %p867_p0 = scmp.ne.s32.totalorder %s1089_s7, %s866_s22 }
  0x28   : > { %770 = vmatprep.mubr.msk.f32.mxu0 %vm281_vm0, %v277_v7  ;;  %v732_v42 = vld [vmem:[%s274_s26] ss:$0 sm:$0xff]  ;;  %p873_p3 = scmp.lt.s32.totalorder %s1089_s7, %s871_s15  ;;  %p874_p4 = scmp.lt.s32.totalorder %s872_s16, %s866_s22 }
  0x29   : > { %p868_p1 = pnand %p867_p0, %p1004_p6 }
  0x2a   : > { %p875_p5 = por %p874_p4, %p873_p3 }
  0x2b   : > { %771 = vmatmul.mubr.msk.f32.gmra.mrb[2].mxu0 %vm281_vm0, %v278_v8  ;;  %p869_p2 = pneg %p868_p1 }
  0x2c   : > { %795 = vmatprep.mubr.msk.f32.mxu0 %vm383_vm1, %v728_v24 }
  0x2d   : > { %p876_p7 = pnand %p875_p5, %p869_p2 }
  0x9f   : > { %v488_v25 = vpop.permute.xlu0 %487 }
  0xa0   : > { %v498_v26 = vpop.permute.xlu1 %497 }
  0xa3   : > { %v493_v27 = vpop.permute.xlu0 %492 }
  0xa4   : > { %v503_v32 = vpop.permute.xlu1 %502 }
  0xfa   : > { %v769_v15 = vpop.f32.mrb[0].mxu0 }
  0xfb   : > { %v360_v16 = vpop.f32.mrb[1].mxu0 }
  0xfc   : > { %v805_v17 = vpack.c.bf16 %v769_v15, %v360_v16 }
  0xfe   : > { %v772_v18 = vpop.f32.mrb[2].mxu0  ;;  %806 = vmatprep.subr.bf16.mxu1 %v805_v17 }
  0xff   : > { %v370_v19 = vpop.f32.mrb[3].mxu0  ;;  %808 = vmatpush3.bf16.msra.mxu1 %v805_v17 }
 0x100   : > { %v809_v20 = vpack.c.bf16 %v772_v18, %v370_v19 }
 0x102   : > { %810 = vmatprep.subr.bf16.mxu1 %v809_v20 }
 0x103   : > { %812 = vmatpush3.bf16.msra.mxu1 %v809_v20 }
 0x106   : > { %782 = vmatmul.mubr.msk.f32.vlgmr.msra.gmra.mrb[0].mxu1 %vm383_vm1, %v380_v21 }
 0x107   : > { %784 = vmatprep.mubr.msk.f32.mxu1 %vm383_vm1, %v381_v22 }
 0x10a   : > { %785 = vmatmul.mubr.msk.f32.gmra.mrb[2].mxu1 %vm383_vm1, %v382_v23 }
 0x1d9   : > { %v783_v28 = vpop.f32.mrb[0].mxu1 }
 0x1da   : > { %v506_v29 = vmul.f32 %v783_v28, %v493_v27  ;;  %v462_v30 = vpop.f32.mrb[1].mxu1 }
 0x1db   : > { %v505_v31 = vmul.f32 %v488_v25, %v462_v30 }
 0x1dd   : > { %v813_v33 = vpack.c.bf16 %v506_v29, %v505_v31  ;;  %v786_v34 = vpop.f32.mrb[2].mxu1 }
 0x1de   : > { %v508_v35 = vmul.f32 %v786_v34, %v503_v32  ;;  %v472_v36 = vpop.f32.mrb[3].mxu1 }
 0x1df   : > { %v507_v37 = vmul.f32 %v498_v26, %v472_v36  ;;  %814 = vmatprep.subr.bf16.mxu0 %v813_v33 }
 0x1e0   : > { %816 = vmatpush3.bf16.msra.mxu0 %v813_v33 }
 0x1e1   : > { %v817_v38 = vpack.c.bf16 %v508_v35, %v507_v37 }
 0x1e3   : > { %818 = vmatprep.subr.bf16.mxu0 %v817_v38 }
 0x1e4   : > { %820 = vmatpush3.bf16.msra.mxu0 %v817_v38 }
 0x1e7   : > { %796 = vmatmul.mubr.msk.f32.vlgmr.msra.gmra.mrb[4].mxu0 %vm383_vm1, %v729_v39 }
 0x1e8   : > { %798 = vmatprep.mubr.msk.f32.mxu0 %vm383_vm1, %v730_v40 }
 0x1eb   : > { %799 = vmatmul.mubr.msk.f32.gmra.mrb[6].mxu0 %vm383_vm1, %v731_v41 }
 0x2ba   : > { %v797_v43 = vpop.f32.mrb[4].mxu0 }
 0x2bb   : > { %v605_v44 = vadd.f32 %v797_v43, %v732_v42  ;;  %v599_v45 = vpop.f32.mrb[5].mxu0 }
 0x2bc   : > { %v600_v46 = vadd.f32 %v732_v42, %v599_v45 }
 0x2bd   : > { %619 = vst [vmem:[%s271_s6 + $0x8] sm:$0xff] %v605_v44 }
 0x2be   : > { %618 = vst [vmem:[%s271_s6] sm:$0xff] %v600_v46  ;;  %v800_v47 = vpop.f32.mrb[6].mxu0 }
 0x2bf   : > { %v615_v48 = vadd.f32 %v800_v47, %v732_v42  ;;  %v609_v49 = vpop.f32.mrb[7].mxu0 }
 0x2c0   : > { %v610_v50 = vadd.f32 %v732_v42, %v609_v49 }
 0x2c1   : > { %621 = vst [vmem:[%s271_s6 + $0x18] sm:$0xff] %v615_v48 }
 0x2c2   : > { %620 = vst [vmem:[%s271_s6 + $0x10] sm:$0xff] %v610_v50 }
 0x2c3   : > { %879 = shalt.err (!%p876_p7)
}
 0x2c4   : > { %s880_s17 = scalar_lea.hbm %s1094_s11, 512  ;;  %s884_s26 = scalar_lea.hbm %s1143_s5, 1024 }
 0x2c5   : > { %p881_p10 = scmp.ne.s32.totalorder %s1094_s11, %s880_s17  ;;  %p885_p13 = scmp.lt.u32.totalorder %s1094_s11, %s1143_s5 }
 0x2c6   : > { %p886_p0 = scmp.lt.u32.totalorder %s884_s26, %s880_s17  ;;  %p888_p2 = scmp.lt.u32.totalorder %s880_s17, %s1094_s11 }
 0x2c7   : > { %p882_p11 = pnand %p881_p10, %p1004_p6 }
 0x2c8   : > { %p887_p1 = por %p886_p0, %p885_p13 }
 0x2c9   : > { %p883_p12 = pneg %p882_p11 }
 0x2ca   : > { %p889_p3 = por %p888_p2, %p887_p1 }
 0x2cc   : > { %p890_p4 = pnand %p889_p3, %p883_p12 }
 0x2ce   : > { %893 = shalt.err (!%p890_p4)
}
 0x2cf   : > { %s932_s8 = smov 128   ;;  %s933_s9 = smov 256  }
 0x2d0   : > { %s934_s10 = smov 8  }
 0x2d1   : > { %821 = dma.vmem_to_hbm [thread:$0]  (%p1004_p6), %s1089_s7, 512, %s1094_s11, %s623_s13, %s932_s8, %s933_s9, %s934_s10  }
 0x2d2 PF: > { %s650_s22 = sand.u32 1, %s916_s18   ;;  %p824_p5 = pnand %p714_p9, %p1008_p8 }
 0x2d3   : > { %s651_s14 = scalar_lea.sflag [#allocation4], %s650_s22 }
 0x2d4   : > { %911 = dma.done.wait (!%p824_p5), %s651_s14, 512  }
 0x2d5   : > { %913 = vsyncadd (!%p824_p5), %s651_s14, 4294966784  ;;  %p15_p7 = scmp.ge.s32.totalorder %s990_s24, 4   ;;  %s1146_s18 = smov %s920_s19 }
 0x2d6   : > { %s1147_s19 = smov %s924_s20  ;;  %s1148_s20 = smov %s1002_s27 }
 0x2d7   : > { %s1149_s21 = smov %s990_s24  ;;  %17 = sbr.rel (!%p15_p7) target bundleno = 3 (0x3), region = 122 }
 0x2de   :  { %656 = vsyncpa [#allocation4], 1 }
 0x2df   :  { %658 = vsyncpa [#allocation4 + $0x1], 1 }

</bundles_post_ra>
